<compile_context>
chip_gen: v7x
topology: tpu7x:2x2x1
jax: 0.10.0
libtpu: 0.0.40
codegen_flags: <defaults>
</compile_context>

<pallas_src>
import functools

import jax
import jax.numpy as jnp
from jax import lax
from jax.experimental import pallas as pl
from jax.experimental.pallas import tpu as pltpu

_LANE = 128


def _focal_elementwise(x, t, alpha, gamma, use_logits):
    """Per-element focal loss; all f32 on the VPU/EUP."""
    if use_logits:
        # Numerically stable BCE-with-logits (same formula PyTorch uses).
        bce = jnp.maximum(x, 0.0) - x * t + jnp.log1p(jnp.exp(-jnp.abs(x)))
    else:
        # PyTorch's binary_cross_entropy clamps log at -100.
        log_x = jnp.maximum(jnp.log(x), -100.0)
        log_1mx = jnp.maximum(jnp.log(1.0 - x), -100.0)
        bce = -(t * log_x + (1.0 - t) * log_1mx)
    pt = jnp.exp(-bce)
    return alpha * (1.0 - pt) ** gamma * bce


def _focal_sum_kernel(x_ref, t_ref, out_ref, *, alpha, gamma, use_logits,
                      total, block_rows):
    i = pl.program_id(0)
    x = x_ref[0]                      # (block_rows, 128) f32
    t = t_ref[0]
    fl = _focal_elementwise(x, t, alpha, gamma, use_logits)
    # Mask out the zero-padding appended by the wrapper.
    row = lax.broadcasted_iota(jnp.int32, x.shape, 0)
    col = lax.broadcasted_iota(jnp.int32, x.shape, 1)
    flat = (i * block_rows + row) * _LANE + col
    fl = jnp.where(flat < total, fl, 0.0)
    # Per-lane (sublane-only) partial sums; the cheap 128*num_blocks-element
    # final reduction + mean happens in XLA.
    out_ref[0] = jnp.sum(fl, axis=0, keepdims=True)       # (1, 128)


def _focal_map_kernel(x_ref, t_ref, out_ref, *, alpha, gamma, use_logits):
    out_ref[0] = _focal_elementwise(x_ref[0], t_ref[0], alpha, gamma,
                                    use_logits)


def focal_loss(inputs, targets, alpha=0.5, gamma=2, logits=True, reduce=True,
               block_rows=1024):
    """Equivalent of FocalLoss(alpha, gamma, logits, reduce)(inputs, targets)."""
    orig_shape = inputs.shape
    x = inputs.reshape(-1).astype(jnp.float32)
    t = targets.reshape(-1).astype(jnp.float32)
    total = x.shape[0]

    rows = pl.cdiv(total, _LANE)
    block_rows = max(1, min(block_rows, rows))
    num_blocks = pl.cdiv(rows, block_rows)
    padded = num_blocks * block_rows * _LANE

    x = jnp.pad(x, (0, padded - total))
    t = jnp.pad(t, (0, padded - total))
    x3 = x.reshape(num_blocks, block_rows, _LANE)
    t3 = t.reshape(num_blocks, block_rows, _LANE)

    in_specs = [
        pl.BlockSpec((1, block_rows, _LANE), lambda i: (i, 0, 0)),
        pl.BlockSpec((1, block_rows, _LANE), lambda i: (i, 0, 0)),
    ]

    if reduce:
        partial = pl.pallas_call(
            functools.partial(_focal_sum_kernel, alpha=float(alpha),
                              gamma=gamma, use_logits=logits, total=total,
                              block_rows=block_rows),
            out_shape=jax.ShapeDtypeStruct((num_blocks, 1, _LANE), jnp.float32),
            grid_spec=pltpu.PrefetchScalarGridSpec(
                num_scalar_prefetch=0,
                grid=(num_blocks,),
                in_specs=in_specs,
                out_specs=pl.BlockSpec((1, 1, _LANE), lambda i: (i, 0, 0)),
            ),
            compiler_params=pltpu.CompilerParams(
                dimension_semantics=("parallel",)),
        )(x3, t3)
        return jnp.sum(partial) / total

    fmap = pl.pallas_call(
        functools.partial(_focal_map_kernel, alpha=float(alpha),
                          gamma=gamma, use_logits=logits),
        out_shape=jax.ShapeDtypeStruct((num_blocks, block_rows, _LANE),
                                       jnp.float32),
        grid_spec=pltpu.PrefetchScalarGridSpec(
            num_scalar_prefetch=0,
            grid=(num_blocks,),
            in_specs=in_specs,
            out_specs=pl.BlockSpec((1, block_rows, _LANE),
                                   lambda i: (i, 0, 0)),
        ),
        compiler_params=pltpu.CompilerParams(
            dimension_semantics=("parallel",)),
    )(x3, t3)
    return fmap.reshape(-1)[:total].reshape(orig_shape)


def _focal_ref(inputs, targets, alpha=0.5, gamma=2, logits=True, reduce=True):
    """Pure-JAX reference mirroring the PyTorch FocalLoss forward."""
    x = inputs.astype(jnp.float32)
    t = targets.astype(jnp.float32)
    if logits:
        bce = jnp.maximum(x, 0.0) - x * t + jnp.log1p(jnp.exp(-jnp.abs(x)))
    else:
        bce = -(t * jnp.maximum(jnp.log(x), -100.0)
                + (1.0 - t) * jnp.maximum(jnp.log(1.0 - x), -100.0))
    pt = jnp.exp(-bce)
    fl = alpha * (1.0 - pt) ** gamma * bce
    return jnp.mean(fl) if reduce else fl


if __name__ == "__main__":
    key = jax.random.PRNGKey(0)
    k1, k2 = jax.random.split(key)
    B, C, H, W = 2, 4, 16, 16
    logits_in = jax.random.normal(k1, (B, C, H, W), dtype=jnp.float32)
    targets = (jax.random.uniform(k2, (B, C, H, W)) > 0.5).astype(jnp.float32)

    # Module defaults: alpha=0.5, gamma=2, logits=True, reduce=True
    loss = jax.block_until_ready(focal_loss(logits_in, targets))
    ref = jax.block_until_ready(_focal_ref(logits_in, targets))
    assert jnp.isfinite(loss), "loss is not finite"
    assert jnp.allclose(loss, ref, rtol=1e-5, atol=1e-6), (loss, ref)

    # reduce=False path (per-element focal loss map)
    fmap = jax.block_until_ready(focal_loss(logits_in, targets, reduce=False))
    fref = jax.block_until_ready(_focal_ref(logits_in, targets, reduce=False))
    assert fmap.shape == logits_in.shape
    assert jnp.allclose(fmap, fref, rtol=1e-5, atol=1e-6), "map mismatch"

    print("KERNEL_OK")
</pallas_src>

<mosaic_0001>
module attributes {stable_mosaic.version = 11 : i64} {
  func.func @_focal_sum_kernel(%arg0: i32, %arg1: memref<1x16x128xf32, #tpu.memory_space<vmem>>, %arg2: memref<1x16x128xf32, #tpu.memory_space<vmem>>, %arg3: memref<1x1x128xf32, #tpu.memory_space<vmem>>) attributes {dimension_semantics = [#tpu.dimension_semantics<parallel>], iteration_bounds = array<i64: 1>, scalar_prefetch = 0 : i64, scratch_operands = 0 : i64, tpu.core_type = #tpu.core_type<tc>, window_params = [{transform_indices = @transform_0, window_bounds = array<i64: 1, 16, 128>}, {transform_indices = @transform_1, window_bounds = array<i64: 1, 16, 128>}, {transform_indices = @transform_2, window_bounds = array<i64: 1, 1, 128>}]} {
    %c0 = arith.constant 0 : index
    %c0_0 = arith.constant 0 : index
    %c0_1 = arith.constant 0 : index
    %0 = vector.load %arg1[%c0, %c0_0, %c0_1] : memref<1x16x128xf32, #tpu.memory_space<vmem>>, vector<1x16x128xf32>
    %1 = vector.shape_cast %0 : vector<1x16x128xf32> to vector<16x128xf32>
    %c0_2 = arith.constant 0 : index
    %c0_3 = arith.constant 0 : index
    %c0_4 = arith.constant 0 : index
    %2 = vector.load %arg2[%c0_2, %c0_3, %c0_4] : memref<1x16x128xf32, #tpu.memory_space<vmem>>, vector<1x16x128xf32>
    %3 = vector.shape_cast %2 : vector<1x16x128xf32> to vector<16x128xf32>
    %cst = arith.constant 0.000000e+00 : f32
    %4 = vector.broadcast %cst : f32 to vector<16x128xf32>
    %5 = arith.maximumf %1, %4 : vector<16x128xf32>
    %6 = arith.mulf %1, %3 : vector<16x128xf32>
    %7 = arith.subf %5, %6 : vector<16x128xf32>
    %8 = math.absf %1 : vector<16x128xf32>
    %cst_5 = arith.constant 0.000000e+00 : f32
    %9 = vector.broadcast %cst_5 : f32 to vector<16x128xf32>
    %10 = arith.subf %9, %8 : vector<16x128xf32>
    %11 = math.exp %10 : vector<16x128xf32>
    %12 = math.log1p %11 : vector<16x128xf32>
    %13 = arith.addf %7, %12 : vector<16x128xf32>
    %cst_6 = arith.constant 0.000000e+00 : f32
    %14 = vector.broadcast %cst_6 : f32 to vector<16x128xf32>
    %15 = arith.subf %14, %13 : vector<16x128xf32>
    %16 = math.exp %15 : vector<16x128xf32>
    %cst_7 = arith.constant 1.000000e+00 : f32
    %17 = vector.broadcast %cst_7 : f32 to vector<16x128xf32>
    %18 = arith.subf %17, %16 : vector<16x128xf32>
    %19 = arith.mulf %18, %18 : vector<16x128xf32>
    %cst_8 = arith.constant 5.000000e-01 : f32
    %20 = vector.broadcast %cst_8 : f32 to vector<16x128xf32>
    %21 = arith.mulf %20, %19 : vector<16x128xf32>
    %22 = arith.mulf %21, %13 : vector<16x128xf32>
    %23 = tpu.iota {dimensions = array<i32: 0>} : vector<16x128xi32>
    %24 = tpu.iota {dimensions = array<i32: 1>} : vector<16x128xi32>
    %c16_i32 = arith.constant 16 : i32
    %25 = arith.muli %arg0, %c16_i32 : i32
    %26 = vector.broadcast %25 : i32 to vector<16x128xi32>
    %27 = arith.addi %26, %23 : vector<16x128xi32>
    %c128_i32 = arith.constant 128 : i32
    %28 = vector.broadcast %c128_i32 : i32 to vector<16x128xi32>
    %29 = arith.muli %27, %28 : vector<16x128xi32>
    %30 = arith.addi %29, %24 : vector<16x128xi32>
    %c2048_i32 = arith.constant 2048 : i32
    %31 = vector.broadcast %c2048_i32 : i32 to vector<16x128xi32>
    %32 = arith.cmpi slt, %30, %31 : vector<16x128xi32>
    %cst_9 = arith.constant 0.000000e+00 : f32
    %33 = vector.broadcast %cst_9 : f32 to vector<16x128xf32>
    %34 = arith.select %32, %22, %33 : vector<16x128xi1>, vector<16x128xf32>
    %cst_10 = arith.constant dense<0.000000e+00> : vector<128xf32>
    %35 = vector.multi_reduction <add>, %34, %cst_10 [0] : vector<16x128xf32> to vector<128xf32>
    %36 = vector.shape_cast %35 : vector<128xf32> to vector<1x128xf32>
    %c0_11 = arith.constant 0 : index
    %c0_12 = arith.constant 0 : index
    %c0_13 = arith.constant 0 : index
    %37 = vector.load %arg3[%c0_11, %c0_12, %c0_13] : memref<1x1x128xf32, #tpu.memory_space<vmem>>, vector<1x1x128xf32>
    %38 = vector.shape_cast %37 : vector<1x1x128xf32> to vector<1x128xf32>
    %39 = vector.shape_cast %36 : vector<1x128xf32> to vector<1x1x128xf32>
    tpu.vector_store %arg3[%c0_11, %c0_12, %c0_13], %39 {strides = array<i32>} : memref<1x1x128xf32, #tpu.memory_space<vmem>>, vector<1x1x128xf32>,
    return
  }
  func.func @transform_0(%arg0: i32) -> (i32, i32, i32) {
    %c0_i32 = arith.constant 0 : i32
    %c0_i32_0 = arith.constant 0 : i32
    %c0_i32_1 = arith.constant 0 : i32
    return %arg0, %c0_i32, %c0_i32_0 : i32, i32, i32
  }
  func.func @transform_1(%arg0: i32) -> (i32, i32, i32) {
    %c0_i32 = arith.constant 0 : i32
    %c0_i32_0 = arith.constant 0 : i32
    %c0_i32_1 = arith.constant 0 : i32
    return %arg0, %c0_i32, %c0_i32_0 : i32, i32, i32
  }
  func.func @transform_2(%arg0: i32) -> (i32, i32, i32) {
    %c0_i32 = arith.constant 0 : i32
    %c0_i32_0 = arith.constant 0 : i32
    %c0_i32_1 = arith.constant 0 : i32
    return %arg0, %c0_i32, %c0_i32_0 : i32, i32, i32
  }
}

</mosaic_0001>

<bundles_post_ra>
// kernel: tpu_custom_call.1
= control target key start
LH: loop header
LB: loop body
LE: loop exit
PB: predicated region body
PF: predicated region fallthrough
CT: control target
= control target key end

     0   :  { %7 = vsyncpa [#allocation3], 0  ;;  %s278_s0 = inlined_call_operand.hbm [shape: f32[1,16,128], index: 0, kind: input, shape index: {}]   ;;  %s279_s1 = inlined_call_operand.hbm [shape: f32[1,16,128], index: 1, kind: input, shape index: {}]   ;;  %s280_s2 = inlined_call_operand.hbm [shape: f32[1,1,128], index: 2, kind: output, shape index: {}]  }
   0x1   :  { %8 = vsyncpa [#allocation6], 0 }
   0x2   :  { %9 = vsyncpa [#allocation4], 0  ;;  %s222_s9 = smov [#allocation2]   ;;  %s150_s13 = scalar_lea.hbm %s278_s0, 256 }
   0x3   :  { %s15_s10 = sshll.u32 %s222_s9, 4  ;;  %p151_p0 = scmp.ne.s32.totalorder %s278_s0, %s150_s13  ;;  %s16_s10 = int_to_ptr.vmem [resolvable:$true] %s15_s10 }
   0x4   :  { %p154_p1 = scmp.lt.u32.totalorder %s150_s13, %s278_s0 }
   0x6   :  { %p156_p2 = pnand %p154_p1, %p151_p0 }
   0x8   :  { %159 = shalt.err (!%p156_p2)
}
   0x9   :  { %s160_s18 = scalar_lea.vmem %s16_s10, 256  ;;  %p165_p4 = scmp.lt.s32.totalorder %s16_s10, %s16_s10 }
   0xa   :  { %p161_p3 = scmp.ne.s32.totalorder %s16_s10, %s160_s18  ;;  %p166_p5 = scmp.lt.s32.totalorder %s160_s18, %s160_s18 }
   0xc   :  { %p167_p6 = por %p166_p5, %p165_p4 }
   0xe   :  { %p168_p7 = pnand %p167_p6, %p161_p3 }
  0x10   :  { %171 = shalt.err (!%p168_p7)
}
  0x11   :  { %s223_s19 = smov 128   ;;  %s224_s20 = smov 8  }
  0x12   :  { %21 = dma.hbm_to_vmem [thread:$0]  %s278_s0, 256, %s16_s10, [#allocation3], %s223_s19, %s223_s19, %s224_s20  }
  0x13   :  { %s225_s23 = smov [#allocation5]   ;;  %s172_s27 = scalar_lea.hbm %s279_s1, 256 }
  0x14   :  { %s27_s24 = sshll.u32 %s225_s23, 4  ;;  %p173_p8 = scmp.ne.s32.totalorder %s279_s1, %s172_s27  ;;  %s28_s24 = int_to_ptr.vmem [resolvable:$true] %s27_s24 }
  0x15   :  { %p176_p9 = scmp.lt.u32.totalorder %s172_s27, %s279_s1 }
  0x17   :  { %p178_p10 = pnand %p176_p9, %p173_p8 }
  0x19   :  { %181 = shalt.err (!%p178_p10)
}
  0x1a   :  { %s182_s4 = scalar_lea.vmem %s28_s24, 256  ;;  %p187_p12 = scmp.lt.s32.totalorder %s28_s24, %s28_s24 }
  0x1b   :  { %p183_p11 = scmp.ne.s32.totalorder %s28_s24, %s182_s4  ;;  %p188_p13 = scmp.lt.s32.totalorder %s182_s4, %s182_s4 }
  0x1d   :  { %p189_p0 = por %p188_p13, %p187_p12 }
  0x1f   :  { %p190_p1 = pnand %p189_p0, %p183_p11 }
  0x21   :  { %193 = shalt.err (!%p190_p1)
}
  0x22   :  { %33 = dma.hbm_to_vmem [thread:$0]  %s279_s1, 256, %s28_s24, [#allocation6], %s223_s19, %s223_s19, %s224_s20  }
  0x23   :  { %216 = dma.done.wait [#allocation3], 256  }
  0x24   :  { %217 = vsyncadd [#allocation3], 4294967040 }
  0x25   :  { %218 = dma.done.wait [#allocation6], 256  }
  0x26   :  { %219 = vsyncadd [#allocation6], 4294967040  ;;  %v40_v0 = vld [vmem:[#allocation2] sm:$0xff]  ;;  %v41_v1 = vld [vmem:[#allocation2 + $0x8] sm:$0xff]  ;;  %v92_v38 = vlaneseq  ;;  %s226_s1 = smov [#allocation7]  }
  0x27   :  { %v50_v2 = vand.u32 2147483647, %v40_v0  ;;  %v51_v3 = vand.u32 2147483647, %v41_v1  ;;  %v42_v14 = vld [vmem:[#allocation5] sm:$0xff]  ;;  %v43_v15 = vld [vmem:[#allocation5 + $0x8] sm:$0xff] }
  0x28   :  { %v44_v17 = vmax.f32 %v40_v0, 0.0  ;;  %v46_v18 = vmul.f32 %v42_v14, %v40_v0  ;;  %v45_v21 = vmax.f32 %v41_v1, 0.0  ;;  %v47_v22 = vmul.f32 %v43_v15, %v41_v1  ;;  %s123_s6 = sshll.u32 %s226_s1, 4  ;;  %s124_s6 = int_to_ptr.vmem [resolvable:$true] %s123_s6 }
  0x29   :  { %v52_v4 = vsub.f32 0.0, %v50_v2  ;;  %v53_v5 = vsub.f32 0.0, %v51_v3  ;;  %v93_v41 = vshrl.u32 %v92_v38, 7  ;;  %v96_v43 = vand.u32 127, %v92_v38  ;;  %s194_s7 = scalar_lea.vmem %s124_s6, 16  ;;  %s198_s8 = scalar_lea.vmem %s124_s6, 32 }
  0x2a   :  { %v48_v26 = vsub.f32 %v44_v17, %v46_v18  ;;  %v49_v29 = vsub.f32 %v45_v21, %v47_v22  ;;  %p195_p2 = scmp.ne.s32.totalorder %s124_s6, %s194_s7  ;;  %p199_p3 = scmp.lt.s32.totalorder %s124_s6, %s124_s6 }
  0x2b   :  { %v54_v6 = vmul.f32 1.442695, %v52_v4  ;;  %v56_v7 = vmul.f32 1.442695, %v53_v5  ;;  %v94_v42 = vadd.s32 8, %v93_v41  ;;  %v101_v44 = vmul.u32 128, %v93_v41  ;;  %p200_p4 = scmp.lt.s32.totalorder %s198_s8, %s194_s7 }
  0x2d   :  { %138 = vpow2.f32 %v54_v6  ;;  %v102_v45 = vmul.u32 128, %v94_v42  ;;  %v103_v50 = vadd.s32 %v101_v44, %v96_v43  ;;  %p201_p5 = por %p200_p4, %p199_p3 }
  0x2e   :  { %140 = vpow2.f32 %v56_v7 }
  0x2f   :  { %v104_v52 = vadd.s32 %v102_v45, %v96_v43  ;;  %vm105_vm2 = vcmp.lt.s32.totalorder %v103_v50, 2048  ;;  %p202_p6 = pnand %p201_p5, %p195_p2 }
  0x31   :  { %vm106_vm3 = vcmp.lt.s32.totalorder %v104_v52, 2048 }
  0x37   :  { %v139_v8 = vpop.eup %138 }
  0x38   :  { %v141_v9 = vpop.eup %140  ;;  %v58_v10 = vadd.f32 1.0, %v139_v8  ;;  %v61_v12 = vmul.f32 -0.5, %v139_v8  ;;  %v64_v19 = vand.u32 2147483647, %v139_v8 }
  0x39   :  { %v67_v11 = vadd.f32 1.0, %v141_v9  ;;  %v70_v13 = vmul.f32 -0.5, %v141_v9  ;;  %v73_v23 = vand.u32 2147483647, %v141_v9 }
  0x3a   :  { %142 = vlog2.f32 %v58_v10  ;;  %v62_v16 = vadd.f32 1.0, %v61_v12  ;;  %vm65_vm0 = vcmp.lt.f32.partialorder %v64_v19, 0.0004427343 }
  0x3b   :  { %144 = vlog2.f32 %v67_v11  ;;  %v71_v20 = vadd.f32 1.0, %v70_v13  ;;  %vm74_vm1 = vcmp.lt.f32.partialorder %v73_v23, 0.0004427343 }
  0x3c   :  { %v63_v24 = vmul.f32 %v139_v8, %v62_v16 }
  0x3d   :  { %v72_v27 = vmul.f32 %v141_v9, %v71_v20 }
  0x44   :  { %v143_v25 = vpop.eup %142 }
  0x45   :  { %v145_v28 = vpop.eup %144  ;;  %v60_v30 = vmul.f32 0.6931472, %v143_v25 }
  0x46   :  { %v69_v31 = vmul.f32 0.6931472, %v145_v28 }
  0x47   :  { %v66_v32 = vsel %vm65_vm0, %v63_v24, %v60_v30 }
  0x48   :  { %v75_v33 = vsel %vm74_vm1, %v72_v27, %v69_v31  ;;  %v76_v34 = vadd.f32 %v66_v32, %v48_v26 }
  0x49   :  { %v77_v35 = vadd.f32 %v75_v33, %v49_v29 }
  0x4a   :  { %v78_v36 = vsub.f32 0.0, %v76_v34 }
  0x4b   :  { %v79_v37 = vsub.f32 0.0, %v77_v35 }
  0x4c   :  { %v80_v39 = vmul.f32 1.442695, %v78_v36 }
  0x4d   :  { %v82_v40 = vmul.f32 1.442695, %v79_v37 }
  0x4e   :  { %146 = vpow2.f32 %v80_v39 }
  0x4f   :  { %148 = vpow2.f32 %v82_v40 }
  0x58   :  { %v147_v46 = vpop.eup %146 }
  0x59   :  { %v149_v47 = vpop.eup %148  ;;  %v84_v48 = vsub.f32 1.0, %v147_v46 }
  0x5a   :  { %v85_v49 = vsub.f32 1.0, %v149_v47 }
  0x5b   :  { %v86_v51 = vmul.f32 %v84_v48, %v84_v48 }
  0x5c   :  { %v87_v53 = vmul.f32 %v85_v49, %v85_v49 }
  0x5d   :  { %v88_v54 = vmul.f32 0.5, %v86_v51 }
  0x5e   :  { %v89_v55 = vmul.f32 0.5, %v87_v53 }
  0x5f   :  { %v90_v56 = vmul.f32 %v88_v54, %v76_v34 }
  0x60   :  { %v91_v57 = vmul.f32 %v89_v55, %v77_v35 }
  0x61   :  { %v107_v58 = vsel %vm105_vm2, %v90_v56, 0.0 }
  0x62   :  { %v108_v59 = vsel %vm106_vm3, %v91_v57, 0.0 }
  0x63   :  { %v109_v60 = vadd.f32 %v108_v59, %v107_v58 }
  0x65   :  { %v110_v61 = vrot.slane %v109_v60, 4 }
  0x67   :  { %v111_v62 = vadd.f32 %v110_v61, %v109_v60 }
  0x69   :  { %v112_v63 = vrot.slane %v111_v62, 2 }
  0x6b   :  { %v113_v0 = vadd.f32 %v112_v63, %v111_v62 }
  0x6d   :  { %v114_v1 = vrot.slane %v113_v0, 1 }
  0x6f   :  { %v115_v2 = vadd.f32 %v114_v1, %v113_v0 }
  0x71   :  { %116 = vst [vmem:[#allocation7] sm:$0x1] %v115_v2 }
  0x72   :  { %205 = shalt.err (!%p202_p6)
}
  0x73   :  { %s206_s11 = scalar_lea.hbm %s280_s2, 16 }
  0x74   :  { %p207_p7 = scmp.ne.s32.totalorder %s280_s2, %s206_s11  ;;  %p210_p8 = scmp.lt.u32.totalorder %s206_s11, %s280_s2 }
  0x76   :  { %p212_p9 = pnand %p210_p8, %p207_p7 }
  0x78   :  { %215 = shalt.err (!%p212_p9)
}
  0x79   :  { %126 = dma.vmem_to_hbm [thread:$0]  %s124_s6, 16, %s280_s2, [#allocation4]  }
  0x7a   :  { %220 = dma.done.wait [#allocation4], 16  }
  0x7b   :  { %221 = vsyncadd [#allocation4], 4294967280 }
  0x7c   :  { %130 = vsyncpa [#allocation3], 1 }
  0x7d   :  { %131 = vsyncpa [#allocation6], 1 }
  0x7e   :  { %132 = vsyncpa [#allocation4], 1 }

</bundles_post_ra>
